<compile_context>
chip_gen: v7x
topology: tpu7x:2x2x1
jax: 0.10.0
libtpu: 0.0.40
codegen_flags: <defaults>
</compile_context>

<pallas_src>
import functools

import jax
import jax.numpy as jnp
from jax.experimental import pallas as pl
from jax.experimental.pallas import tpu as pltpu


def _round_up(x, m):
    return ((x + m - 1) // m) * m


def _choose_tiling(out_len, min_lane, *, rows_max=32, lane_max=8192, target_blocks=4):
    """Pick (rows_per_block, lane_tile).

    Large inputs get ~1 MiB main tiles (>= ~2 MiB of HBM traffic per grid step
    counting the output) so the fixed per-step overhead is amortized; tiles are
    shrunk for smaller inputs so the grid keeps >= target_blocks blocks and the
    two v7x TensorCores both get work (no-op on single-core v5e/v6e).
    """
    rows, lane = rows_max, max(lane_max, min_lane)
    while pl.cdiv(out_len, rows * lane) < target_blocks:
        if lane > min_lane:
            lane = max(lane // 2, min_lane)
        elif rows > 8:
            rows //= 2
        else:
            break
    return rows, lane


def _conv1d_kernel(w_ref, b_ref, xm_ref, xh_ref, o_ref, wide_ref, *, filter_width):
    # w_ref: SMEM (W,) f32, b_ref: SMEM (1,) f32
    # xm_ref: VMEM (rows, lane)   -- main signal rows (row r = x[r*lane:(r+1)*lane])
    # xh_ref: VMEM (rows, halo)   -- the `halo` samples following each main row
    # o_ref : VMEM (rows, lane)   -- lane-dense output tile
    # wide_ref: VMEM scratch (rows, lane + halo)
    rows, lane = o_ref.shape
    halo = xh_ref.shape[1]
    row_w = lane + halo

    xm = xm_ref[...]
    # Assemble the halo-extended window in VMEM scratch; both stores are
    # lane-aligned (lane and halo are multiples of 128).
    wide_ref[:, :lane] = xm
    wide_ref[:, lane:] = xh_ref[...]

    # Tap 0 carries the bias (folded into the first multiply-add).
    acc = w_ref[0] * xm + b_ref[0]

    if filter_width > 1:
        xc = wide_ref[...]
        # Static unroll over the (small) filter width: one XLU lane rotation of
        # the assembled tile + one scalar-broadcast multiply-add per tap.
        for j in range(1, filter_width):
            win = pltpu.roll(xc, shift=row_w - j, axis=1)  # win[:, k] = xc[:, k + j]
            acc = acc + w_ref[j] * win[:, :lane]

    o_ref[...] = acc.astype(o_ref.dtype)


def numpy_conv1d(x, filt, bias, *, rows_per_block=None, lane_tile=None):
    """Pallas equivalent of NumpyConv1d.forward: correlate(x, filt, 'valid') + bias."""
    n = x.shape[0]
    w = filt.shape[0]
    if w > n:
        raise ValueError(f"filter width {w} exceeds signal length {n}")
    out_len = n - w + 1

    halo = max(128, _round_up(w - 1, 128))  # lane-aligned halo covering the taps
    if rows_per_block is None or lane_tile is None:
        auto_rows, auto_lane = _choose_tiling(out_len, halo)
        rows_per_block = auto_rows if rows_per_block is None else rows_per_block
        lane_tile = auto_lane if lane_tile is None else lane_tile
    rows_per_block = _round_up(max(rows_per_block, 8), 8)
    lane_tile = _round_up(max(lane_tile, halo), 128)

    num_blocks = pl.cdiv(out_len, rows_per_block * lane_tile)
    total_rows = num_blocks * rows_per_block

    # Lay the signal out as (total_rows + 1, lane_tile) via a plain pad+reshape
    # (no gather, no duplicated full copy).  Row r of the main view is
    # x_pad[r*lane:(r+1)*lane]; its halo is the first `halo` samples of row
    # r+1, extracted once as a small (total_rows, halo) strided slice.
    pad_len = (total_rows + 1) * lane_tile
    x_pad = jnp.pad(x, (0, pad_len - n))
    x2d = x_pad.reshape(total_rows + 1, lane_tile)
    x_halo = x2d[1:, :halo]

    kernel = functools.partial(_conv1d_kernel, filter_width=w)

    out2d = pl.pallas_call(
        kernel,
        out_shape=jax.ShapeDtypeStruct((total_rows, lane_tile), x.dtype),
        grid=(num_blocks,),
        in_specs=[
            pl.BlockSpec(memory_space=pltpu.MemorySpace.SMEM),            # filter
            pl.BlockSpec(memory_space=pltpu.MemorySpace.SMEM),            # bias
            pl.BlockSpec((rows_per_block, lane_tile), lambda i: (i, 0)),  # main rows
            pl.BlockSpec((rows_per_block, halo), lambda i: (i, 0)),       # halo rows
        ],
        out_specs=pl.BlockSpec((rows_per_block, lane_tile), lambda i: (i, 0)),
        scratch_shapes=[pltpu.VMEM((rows_per_block, lane_tile + halo), x.dtype)],
        compiler_params=pltpu.CompilerParams(
            dimension_semantics=("parallel",),            # megacore split on v7x
            vmem_limit_bytes=32 * 1024 * 1024,
        ),
    )(filt, bias, x2d, x_halo)

    out = out2d.reshape(-1)
    if out_len != out.shape[0]:
        out = out[:out_len]  # only pay the tail-slice copy for unaligned sizes
    return out


if __name__ == "__main__":
    key = jax.random.PRNGKey(0)
    k_x, k_w, k_b, k_x2, k_x3 = jax.random.split(key, 5)

    FILTER_WIDTH = 4  # as in NumpyConv1d(filter_width=4)
    filt = jax.random.normal(k_w, (FILTER_WIDTH,), dtype=jnp.float32)
    bias = jax.random.normal(k_b, (1,), dtype=jnp.float32)

    # 1) Module-scale toy size (single tiny block).
    N = 16
    x = jax.random.normal(k_x, (N,), dtype=jnp.float32)
    out = jax.block_until_ready(numpy_conv1d(x, filt, bias))
    ref = jnp.correlate(x, filt, mode="valid") + bias
    assert out.shape == (N - FILTER_WIDTH + 1,)
    assert jnp.allclose(out, ref, atol=1e-5, rtol=1e-5)

    # 2) Multi-block grid path with explicit small tiles.
    N2 = 3000
    x2 = jax.random.normal(k_x2, (N2,), dtype=jnp.float32)
    out2 = jax.block_until_ready(
        numpy_conv1d(x2, filt, bias, rows_per_block=8, lane_tile=128))
    ref2 = jnp.correlate(x2, filt, mode="valid") + bias
    assert out2.shape == (N2 - FILTER_WIDTH + 1,)
    assert jnp.allclose(out2, ref2, atol=1e-4, rtol=1e-4)

    # 3) Default (auto) tiling path with several blocks.
    N3 = 40000
    x3 = jax.random.normal(k_x3, (N3,), dtype=jnp.float32)
    out3 = jax.block_until_ready(numpy_conv1d(x3, filt, bias))
    ref3 = jnp.correlate(x3, filt, mode="valid") + bias
    assert out3.shape == (N3 - FILTER_WIDTH + 1,)
    assert jnp.allclose(out3, ref3, atol=1e-4, rtol=1e-4)

    print("KERNEL_OK")
</pallas_src>

<mosaic_0001>
module attributes {stable_mosaic.version = 11 : i64} {
  func.func @_conv1d_kernel(%arg0: i32, %arg1: memref<4xf32, #tpu.memory_space<smem>>, %arg2: memref<1xf32, #tpu.memory_space<smem>>, %arg3: memref<8x128xf32, #tpu.memory_space<vmem>>, %arg4: memref<8x128xf32, #tpu.memory_space<vmem>>, %arg5: memref<8x128xf32, #tpu.memory_space<vmem>>, %arg6: memref<8x256xf32, #tpu.memory_space<vmem>>) attributes {dimension_semantics = [#tpu.dimension_semantics<parallel>], iteration_bounds = array<i64: 1>, scalar_prefetch = 0 : i64, scratch_operands = 1 : i64, tpu.core_type = #tpu.core_type<tc>, window_params = [{transform_indices = @transform_0, window_bounds = array<i64: 4>}, {transform_indices = @transform_1, window_bounds = array<i64: 1>}, {transform_indices = @transform_2, window_bounds = array<i64: 8, 128>}, {transform_indices = @transform_3, window_bounds = array<i64: 8, 128>}, {transform_indices = @transform_4, window_bounds = array<i64: 8, 128>}]} {
    %c0 = arith.constant 0 : index
    %c0_0 = arith.constant 0 : index
    %0 = vector.load %arg3[%c0, %c0_0] : memref<8x128xf32, #tpu.memory_space<vmem>>, vector<8x128xf32>
    %c0_1 = arith.constant 0 : index
    %c0_2 = arith.constant 0 : index
    %1 = vector.load %arg6[%c0_1, %c0_2] : memref<8x256xf32, #tpu.memory_space<vmem>>, vector<8x128xf32>
    tpu.vector_store %arg6[%c0_1, %c0_2], %0 {strides = array<i32>} : memref<8x256xf32, #tpu.memory_space<vmem>>, vector<8x128xf32>,
    %c0_3 = arith.constant 0 : index
    %c0_4 = arith.constant 0 : index
    %2 = vector.load %arg4[%c0_3, %c0_4] : memref<8x128xf32, #tpu.memory_space<vmem>>, vector<8x128xf32>
    %c0_5 = arith.constant 0 : index
    %c128 = arith.constant 128 : index
    %3 = vector.load %arg6[%c0_5, %c128] : memref<8x256xf32, #tpu.memory_space<vmem>>, vector<8x128xf32>
    tpu.vector_store %arg6[%c0_5, %c128], %2 {strides = array<i32>} : memref<8x256xf32, #tpu.memory_space<vmem>>, vector<8x128xf32>,
    %c0_6 = arith.constant 0 : index
    %4 = memref.load %arg1[%c0_6] : memref<4xf32, #tpu.memory_space<smem>>
    %5 = vector.broadcast %4 : f32 to vector<8x128xf32>
    %6 = arith.mulf %5, %0 : vector<8x128xf32>
    %c0_7 = arith.constant 0 : index
    %7 = memref.load %arg2[%c0_7] : memref<1xf32, #tpu.memory_space<smem>>
    %8 = vector.broadcast %7 : f32 to vector<8x128xf32>
    %9 = arith.addf %6, %8 : vector<8x128xf32>
    %c0_8 = arith.constant 0 : index
    %c0_9 = arith.constant 0 : index
    %10 = vector.load %arg6[%c0_8, %c0_9] : memref<8x256xf32, #tpu.memory_space<vmem>>, vector<8x256xf32>
    %c255_i32 = arith.constant 255 : i32
    %11 = tpu.dynamic_rotate %10 by %c255_i32 dim 1 : vector<8x256xf32>, i32 -> vector<8x256xf32>
    %c1 = arith.constant 1 : index
    %12 = memref.load %arg1[%c1] : memref<4xf32, #tpu.memory_space<smem>>
    %13 = vector.extract_strided_slice %11 {offsets = [0, 0], sizes = [8, 128], strides = [1, 1]} : vector<8x256xf32> to vector<8x128xf32>
    %14 = vector.broadcast %12 : f32 to vector<8x128xf32>
    %15 = arith.mulf %14, %13 : vector<8x128xf32>
    %16 = arith.addf %9, %15 : vector<8x128xf32>
    %c254_i32 = arith.constant 254 : i32
    %17 = tpu.dynamic_rotate %10 by %c254_i32 dim 1 : vector<8x256xf32>, i32 -> vector<8x256xf32>
    %c2 = arith.constant 2 : index
    %18 = memref.load %arg1[%c2] : memref<4xf32, #tpu.memory_space<smem>>
    %19 = vector.extract_strided_slice %17 {offsets = [0, 0], sizes = [8, 128], strides = [1, 1]} : vector<8x256xf32> to vector<8x128xf32>
    %20 = vector.broadcast %18 : f32 to vector<8x128xf32>
    %21 = arith.mulf %20, %19 : vector<8x128xf32>
    %22 = arith.addf %16, %21 : vector<8x128xf32>
    %c253_i32 = arith.constant 253 : i32
    %23 = tpu.dynamic_rotate %10 by %c253_i32 dim 1 : vector<8x256xf32>, i32 -> vector<8x256xf32>
    %c3 = arith.constant 3 : index
    %24 = memref.load %arg1[%c3] : memref<4xf32, #tpu.memory_space<smem>>
    %25 = vector.extract_strided_slice %23 {offsets = [0, 0], sizes = [8, 128], strides = [1, 1]} : vector<8x256xf32> to vector<8x128xf32>
    %26 = vector.broadcast %24 : f32 to vector<8x128xf32>
    %27 = arith.mulf %26, %25 : vector<8x128xf32>
    %28 = arith.addf %22, %27 : vector<8x128xf32>
    %c0_10 = arith.constant 0 : index
    %c0_11 = arith.constant 0 : index
    %29 = vector.load %arg5[%c0_10, %c0_11] : memref<8x128xf32, #tpu.memory_space<vmem>>, vector<8x128xf32>
    tpu.vector_store %arg5[%c0_10, %c0_11], %28 {strides = array<i32>} : memref<8x128xf32, #tpu.memory_space<vmem>>, vector<8x128xf32>,
    return
  }
  func.func @transform_0(%arg0: i32) -> i32 {
    %c0_i32 = arith.constant 0 : i32
    %c0_i32_0 = arith.constant 0 : i32
    return %c0_i32 : i32
  }
  func.func @transform_1(%arg0: i32) -> i32 {
    %c0_i32 = arith.constant 0 : i32
    %c0_i32_0 = arith.constant 0 : i32
    return %c0_i32 : i32
  }
  func.func @transform_2(%arg0: i32) -> (i32, i32) {
    %c0_i32 = arith.constant 0 : i32
    %c0_i32_0 = arith.constant 0 : i32
    return %arg0, %c0_i32 : i32, i32
  }
  func.func @transform_3(%arg0: i32) -> (i32, i32) {
    %c0_i32 = arith.constant 0 : i32
    %c0_i32_0 = arith.constant 0 : i32
    return %arg0, %c0_i32 : i32, i32
  }
  func.func @transform_4(%arg0: i32) -> (i32, i32) {
    %c0_i32 = arith.constant 0 : i32
    %c0_i32_0 = arith.constant 0 : i32
    return %arg0, %c0_i32 : i32, i32
  }
}

</mosaic_0001>

<bundles_post_ra>
// kernel: tpu_custom_call.1
= control target key start
LH: loop header
LB: loop body
LE: loop exit
PB: predicated region body
PF: predicated region fallthrough
CT: control target
= control target key end

     0   :  { %10 = vsyncpa [#allocation7], 0  ;;  %s243_s0 = inlined_call_operand.vmem [shape: f32[4], index: 0, kind: input, shape index: {}]   ;;  %s244_s1 = inlined_call_operand.<no memory space> [shape: f32[1], index: 1, kind: input, shape index: {}]   ;;  %s245_s2 = inlined_call_operand.hbm [shape: f32[9,128], index: 2, kind: input, shape index: {}]   ;;  %s246_s3 = inlined_call_operand.vmem [shape: f32[8,128], index: 3, kind: input, shape index: {}]   ;;  %s247_s4 = inlined_call_operand.hbm [shape: f32[8,128], index: 4, kind: output, shape index: {}]  }
   0x1   :  { %11 = vsyncpa [#allocation5], 0 }
   0x2   :  { %12 = vsyncpa [#allocation6], 0  ;;  %s19_s17 = sshll.u32 %s243_s0, 4  ;;  %s20_s17 = int_to_ptr.vmem [resolvable:$true] %s19_s17 }
   0x3   :  { %s114_s18 = scalar_lea.vmem %s20_s17, 16  ;;  %p119_p1 = scmp.lt.s32.totalorder %s20_s17, %s20_s17 }
   0x4   :  { %p115_p0 = scmp.ne.s32.totalorder %s20_s17, %s114_s18  ;;  %p120_p2 = scmp.lt.s32.totalorder %s114_s18, %s114_s18 }
   0x6   :  { %p121_p3 = por %p120_p2, %p119_p1 }
   0x8   :  { %p122_p4 = pnand %p121_p3, %p115_p0 }
   0xa   :  { %125 = shalt.err (!%p122_p4)
}
   0xb   :  { %s176_s19 = smov [#allocation4]   ;;  %s177_s20 = smov [#allocation8]  }
   0xc   :  { %22 = dma.vmem_to_smem %s20_s17, 16, %s176_s19, [#allocation7]  }
   0xd   :  { %s31_s21 = sshll.u32 %s177_s20, 4  ;;  %s126_s24 = scalar_lea.hbm %s245_s2, 128  ;;  %s32_s21 = int_to_ptr.vmem [resolvable:$true] %s31_s21 }
   0xe   :  { %p127_p5 = scmp.ne.s32.totalorder %s245_s2, %s126_s24  ;;  %s128_s28 = scalar_lea.hbm %s245_s2, 256 }
   0xf   :  { %p129_p6 = scmp.lt.u32.totalorder %s128_s28, %s126_s24  ;;  %p130_p7 = scmp.lt.u32.totalorder %s126_s24, %s245_s2 }
  0x11   :  { %p131_p8 = por %p130_p7, %p129_p6 }
  0x13   :  { %p132_p9 = pnand %p131_p8, %p127_p5 }
  0x15   :  { %135 = shalt.err (!%p132_p9)
}
  0x16   :  { %s136_s5 = scalar_lea.vmem %s32_s21, 128  ;;  %p141_p11 = scmp.lt.s32.totalorder %s32_s21, %s32_s21 }
  0x17   :  { %p137_p10 = scmp.ne.s32.totalorder %s32_s21, %s136_s5  ;;  %p142_p12 = scmp.lt.s32.totalorder %s136_s5, %s136_s5 }
  0x19   :  { %p143_p13 = por %p142_p12, %p141_p11 }
  0x1b   :  { %p144_p0 = pnand %p143_p13, %p137_p10 }
  0x1d   :  { %147 = shalt.err (!%p144_p0)
}
  0x1e   :  { %34 = dma.hbm_to_vmem [thread:$0]  %s245_s2, 128, %s32_s21, [#allocation5]  }
  0x1f   :  { %170 = dma.done.wait [#allocation7], 16  }
  0x20   :  { %171 = vsyncadd [#allocation7], 4294967280 }
  0x21   :  { %172 = dma.done.wait [#allocation5], 128  }
  0x22   :  { %173 = vsyncadd [#allocation5], 4294967168 }
  0x23   :  { %43 = sfence }
  0x24   :  { %v44_v0 = vld [vmem:[#allocation8] sm:$0xff]  ;;  %s178_s8 = smov 126   ;;  %s179_s9 = smov 127   ;;  %v60_v2 = vlaneseq  ;;  %v52_v8 = vstv %s244_s1 }
  0x25   :  { %68 = vrot.lane.b32.xlu1 %v44_v0, %s178_s8  ;;  %56 = vrot.lane.b32.xlu0 %v44_v0, %s179_s9  ;;  %v46_v1 = vld [vmem:[%s246_s3] sm:$0xff]  ;;  %s180_s12 = smov 125   ;;  %s48_s2 = sld [smem:[#allocation4]] }
  0x26   :  { %s105_s13 = sld [smem:[#allocation4 + $0x1]]  ;;  %s106_s14 = sld [smem:[#allocation4 + $0x2]]  ;;  %v61_v4 = vand.u32 127, %v60_v2 }
  0x27   :  { %s107_s15 = sld [smem:[#allocation4 + $0x3]]  ;;  %s181_s3 = smov [#allocation9]  }
  0x28   :  { %vm72_vm0 = vcmp.lt.s32.totalorder %v61_v4, 126  ;;  %vm62_vm1 = vcmp.lt.s32.totalorder %v61_v4, 127  ;;  %vm82_vm2 = vcmp.lt.s32.totalorder %v61_v4, 125  ;;  %s95_s18 = sshll.u32 %s181_s3, 4  ;;  %s96_s18 = int_to_ptr.vmem [resolvable:$true] %s95_s18 }
  0x29   :  { %70 = vrot.lane.b32.xlu1 %v46_v1, %s178_s8  ;;  %58 = vrot.lane.b32.xlu0 %v46_v1, %s179_s9  ;;  %s148_s1 = scalar_lea.vmem %s96_s18, 128  ;;  %p153_p2 = scmp.lt.s32.totalorder %s96_s18, %s96_s18 }
  0x2a   :  { %p149_p1 = scmp.ne.s32.totalorder %s96_s18, %s148_s1  ;;  %p154_p3 = scmp.lt.s32.totalorder %s148_s1, %s148_s1 }
  0x2b   :  { %v49_v3 = vstv %s48_s2 }
  0x2c   :  { %v50_v6 = vmul.f32 %v49_v3, %v44_v0  ;;  %v65_v10 = vstv %s105_s13  ;;  %v75_v13 = vstv %s106_s14  ;;  %p155_p4 = por %p154_p3, %p153_p2 }
  0x2d   :  { %80 = vrot.lane.b32.xlu1 %v46_v1, %s180_s12  ;;  %78 = vrot.lane.b32.xlu0 %v44_v0, %s180_s12  ;;  %v85_v18 = vstv %s107_s15 }
  0x2e   :  { %v53_v12 = vadd.f32 %v52_v8, %v50_v6  ;;  %p156_p5 = pnand %p155_p4, %p149_p1 }
  0x97   :  { %v69_v5 = vpop.permute.xlu1 %68  ;;  %v57_v7 = vpop.permute.xlu0 %56 }
  0x9b   :  { %v71_v9 = vpop.permute.xlu1 %70  ;;  %v59_v11 = vpop.permute.xlu0 %58 }
  0x9c   :  { %v73_v14 = vsel %vm72_vm0, %v69_v5, %v71_v9  ;;  %v63_v15 = vsel %vm62_vm1, %v57_v7, %v59_v11 }
  0x9d   :  { %v66_v16 = vmul.f32 %v65_v10, %v63_v15  ;;  %v76_v19 = vmul.f32 %v75_v13, %v73_v14 }
  0x9f   :  { %v81_v17 = vpop.permute.xlu1 %80  ;;  %v67_v20 = vadd.f32 %v66_v16, %v53_v12  ;;  %v79_v21 = vpop.permute.xlu0 %78 }
  0xa0   :  { %v83_v22 = vsel %vm82_vm2, %v79_v21, %v81_v17 }
  0xa1   :  { %v86_v23 = vmul.f32 %v85_v18, %v83_v22  ;;  %v77_v24 = vadd.f32 %v76_v19, %v67_v20 }
  0xa3   :  { %v87_v25 = vadd.f32 %v86_v23, %v77_v24 }
  0xa5   :  { %88 = vst [vmem:[#allocation9] sm:$0xff] %v87_v25 }
  0xa6   :  { %159 = shalt.err (!%p156_p5)
}
  0xa7   :  { %s160_s21 = scalar_lea.hbm %s247_s4, 128 }
  0xa8   :  { %p161_p6 = scmp.ne.s32.totalorder %s247_s4, %s160_s21  ;;  %p164_p7 = scmp.lt.u32.totalorder %s160_s21, %s247_s4 }
  0xaa   :  { %p166_p8 = pnand %p164_p7, %p161_p6 }
  0xac   :  { %169 = shalt.err (!%p166_p8)
}
  0xad   :  { %98 = dma.vmem_to_hbm [thread:$0]  %s96_s18, 128, %s247_s4, [#allocation6]  }
  0xae   :  { %174 = dma.done.wait [#allocation6], 128  }
  0xaf   :  { %175 = vsyncadd [#allocation6], 4294967168 }
  0xb0   :  { %102 = vsyncpa [#allocation5], 1 }
  0xb1   :  { %103 = vsyncpa [#allocation6], 1 }
  0xb2   :  { %104 = vsyncpa [#allocation7], 1 }

</bundles_post_ra>
